<compile_context>
chip_gen: v6e
topology: v6e:2x2x1
jax: 0.10.0
libtpu: 0.0.40
codegen_flags: <defaults>
</compile_context>

<pallas_src>
import jax
import jax.numpy as jnp
from jax.experimental import pallas as pl
from jax.experimental.pallas import tpu as pltpu

NUM_CLASSES = 10
C_PAD = 128          # lane-dense class axis (one full vreg lane width)


def _round_up(n, m):
    return ((n + m - 1) // m) * m


def _chip_tiling():
    """Pick (max batch tile, vmem limit) from the chip's physical VMEM."""
    try:
        vmem_bytes = pltpu.get_tpu_info().vmem_capacity_bytes
    except Exception:
        vmem_bytes = 64 * 1024 * 1024            # conservative default (v7x)
    if vmem_bytes >= 128 * 1024 * 1024:          # v5e / v6e: 128 MiB physical
        return 4096, 64 * 1024 * 1024
    return 2048, 48 * 1024 * 1024                # v7x: 64 MiB physical


def _linear_relu_logsoftmax_kernel(x_ref, w_ref, b_ref, mask_ref, o_ref):
    # x_ref: (tile_b, 784) native dtype, w_ref: (784, 128) bf16 (pre-T + pad),
    # b_ref: (1, 128) f32, mask_ref: (1, 128) f32 {0 real lanes, -inf pad},
    # o_ref: (tile_b, 128) f32.
    x = x_ref[...].astype(jnp.bfloat16)          # in-kernel cast; VPU slack
    w = w_ref[...]

    # fc1: y = x @ W^T + b   (bf16 MXU matmul, f32 accumulation, f32 bias add)
    z = jnp.dot(x, w, preferred_element_type=jnp.float32) + b_ref[...]

    # ReLU, then additive -inf mask on the 118 padded class lanes so they
    # cannot leak exp(0) terms into the log-sum-exp (mask BEFORE max/sum).
    z = jnp.maximum(z, 0.0) + mask_ref[...]

    # Numerically stable LogSoftmax over the class axis.
    m = jnp.max(z, axis=-1, keepdims=True)
    s = z - m
    lse = jnp.log(jnp.sum(jnp.exp(s), axis=-1, keepdims=True))
    o_ref[...] = (s - lse).astype(o_ref.dtype)


def prepare_params(weight, bias, c_pad=C_PAD):
    """One-time parameter prep (hoisted out of the steady-state forward path).

    weight: (10, 784) PyTorch layout; bias: (10,).
    Returns:
      W^T zero-padded to (784, c_pad) in bf16,
      bias padded to (1, c_pad) in f32,
      additive pad-lane mask (1, c_pad): 0 on real lanes, -inf on pad lanes.
    """
    C, D = weight.shape
    w_t = jnp.zeros((D, c_pad), jnp.bfloat16).at[:, :C].set(
        weight.T.astype(jnp.bfloat16))
    b_p = jnp.zeros((1, c_pad), jnp.float32).at[:, :C].set(
        bias.astype(jnp.float32))
    mask = jnp.full((1, c_pad), -jnp.inf, jnp.float32).at[:, :C].set(0.0)
    return w_t, b_p, mask


def linear_forward(x_nchw, w_prepped, b_prepped, mask):
    """x_nchw: (B, 1, 28, 28) any float dtype; params from prepare_params."""
    B = x_nchw.shape[0]
    x2d = x_nchw.reshape(B, -1)                  # x.view(B, -1); native dtype
    D = x2d.shape[1]
    c_pad = w_prepped.shape[1]

    tile_cap, vmem_limit = _chip_tiling()

    # Batch tiling. For moderate/large batches force >= 2 grid steps so a
    # 2-TensorCore chip (v7x) shards the "parallel" axis across both cores /
    # HBM paths; the ragged final block needs no host-side padding.
    if B <= tile_cap:
        tile_b = _round_up(pl.cdiv(B, 2), 8) if B >= 512 else B
    else:
        tile_b = tile_cap
    num_tiles = pl.cdiv(B, tile_b)

    cost = pl.CostEstimate(
        flops=2 * B * D * c_pad,
        transcendentals=B * c_pad,
        bytes_accessed=(B * D * x2d.dtype.itemsize
                        + D * c_pad * 2            # bf16 weights
                        + 2 * c_pad * 4            # bias + mask
                        + B * c_pad * 4),          # f32 output
    )

    out_padded = pl.pallas_call(
        _linear_relu_logsoftmax_kernel,
        out_shape=jax.ShapeDtypeStruct((B, c_pad), jnp.float32),
        grid=(num_tiles,),
        in_specs=[
            pl.BlockSpec((tile_b, D), lambda i: (i, 0)),   # x streams per tile
            pl.BlockSpec((D, c_pad), lambda i: (0, 0)),    # W resident (bf16)
            pl.BlockSpec((1, c_pad), lambda i: (0, 0)),    # b resident
            pl.BlockSpec((1, c_pad), lambda i: (0, 0)),    # pad-lane mask
        ],
        out_specs=pl.BlockSpec((tile_b, c_pad), lambda i: (i, 0)),
        compiler_params=pltpu.CompilerParams(
            dimension_semantics=("parallel",),             # 2 TCs on v7x
            vmem_limit_bytes=vmem_limit,
        ),
        cost_estimate=cost,
        # Further option if a profile shows exposed DMA between grid steps:
        # pipeline_mode=pl.Buffered(3) on the x BlockSpec.
    )(x2d, w_prepped, b_prepped, mask)

    # Strip any ragged-tile rows (>= B) and the 118 padded class lanes.
    return out_padded[:B, :NUM_CLASSES]


if __name__ == "__main__":
    key = jax.random.PRNGKey(0)
    kx, kw, kb = jax.random.split(key, 3)

    B, C_in, H, W = 2, 1, 28, 28   # flatten -> 784, matching nn.Linear(784, 10)
    n_classes = 10

    x = jax.random.normal(kx, (B, C_in, H, W), dtype=jnp.float32)

    # Deterministic parameter init (PyTorch-style uniform bound 1/sqrt(fan_in)).
    fan_in = C_in * H * W
    bound = 1.0 / (fan_in ** 0.5)
    weight = jax.random.uniform(kw, (n_classes, fan_in), dtype=jnp.float32,
                                minval=-bound, maxval=bound)
    bias = jax.random.uniform(kb, (n_classes,), dtype=jnp.float32,
                              minval=-bound, maxval=bound)

    # One-time parameter preparation (transpose + pad + mask), off the hot path.
    w_prepped, b_prepped, mask = prepare_params(weight, bias)

    out = linear_forward(x, w_prepped, b_prepped, mask)
    jax.block_until_ready(out)

    # Pure-JAX f32 reference check (bf16 matmul => loosened tolerance).
    ref = jax.nn.log_softmax(
        jax.nn.relu(x.reshape(B, -1) @ weight.T + bias), axis=1)
    assert out.shape == (B, n_classes), "bad output shape"
    assert jnp.allclose(out, ref, atol=3e-2, rtol=3e-2), "mismatch vs reference"

    print("KERNEL_OK")
</pallas_src>

<mosaic_0001>
module attributes {stable_mosaic.version = 11 : i64} {
  func.func @_linear_relu_logsoftmax_kernel(%arg0: i32, %arg1: memref<2x784xf32, #tpu.memory_space<vmem>>, %arg2: memref<784x128xbf16, #tpu.memory_space<vmem>>, %arg3: memref<1x128xf32, #tpu.memory_space<vmem>>, %arg4: memref<1x128xf32, #tpu.memory_space<vmem>>, %arg5: memref<2x128xf32, #tpu.memory_space<vmem>>) attributes {dimension_semantics = [#tpu.dimension_semantics<parallel>], iteration_bounds = array<i64: 1>, scalar_prefetch = 0 : i64, scratch_operands = 0 : i64, tpu.core_type = #tpu.core_type<tc>, window_params = [{transform_indices = @transform_0, window_bounds = array<i64: 2, 784>}, {pipeline_mode = #tpu.pipeline_mode<synchronous>, transform_indices = @transform_1, window_bounds = array<i64: 784, 128>}, {pipeline_mode = #tpu.pipeline_mode<synchronous>, transform_indices = @transform_2, window_bounds = array<i64: 1, 128>}, {pipeline_mode = #tpu.pipeline_mode<synchronous>, transform_indices = @transform_3, window_bounds = array<i64: 1, 128>}, {transform_indices = @transform_4, window_bounds = array<i64: 2, 128>}]} {
    %c0 = arith.constant 0 : index
    %c0_0 = arith.constant 0 : index
    %0 = vector.load %arg1[%c0, %c0_0] : memref<2x784xf32, #tpu.memory_space<vmem>>, vector<2x784xf32>
    %1 = arith.truncf %0 : vector<2x784xf32> to vector<2x784xbf16>
    %c0_1 = arith.constant 0 : index
    %c0_2 = arith.constant 0 : index
    %2 = vector.load %arg2[%c0_1, %c0_2] : memref<784x128xbf16, #tpu.memory_space<vmem>>, vector<784x128xbf16>
    %cst = arith.constant dense<0.000000e+00> : vector<2x128xf32>
    %3 = tpu.matmul %1, %2, %cst {dimension_numbers = #tpu.dot_dimension_numbers<[1], [0], [0], [1], [0, 0, 1, 1], [], []>} : vector<2x784xbf16>, vector<784x128xbf16>, vector<2x128xf32> -> vector<2x128xf32>
    %c0_3 = arith.constant 0 : index
    %c0_4 = arith.constant 0 : index
    %4 = vector.load %arg3[%c0_3, %c0_4] : memref<1x128xf32, #tpu.memory_space<vmem>>, vector<1x128xf32>
    %5 = vector.broadcast %4 : vector<1x128xf32> to vector<2x128xf32>
    %6 = arith.addf %3, %5 : vector<2x128xf32>
    %cst_5 = arith.constant 0.000000e+00 : f32
    %7 = vector.broadcast %cst_5 : f32 to vector<2x128xf32>
    %8 = arith.maximumf %6, %7 : vector<2x128xf32>
    %c0_6 = arith.constant 0 : index
    %c0_7 = arith.constant 0 : index
    %9 = vector.load %arg4[%c0_6, %c0_7] : memref<1x128xf32, #tpu.memory_space<vmem>>, vector<1x128xf32>
    %10 = vector.broadcast %9 : vector<1x128xf32> to vector<2x128xf32>
    %11 = arith.addf %8, %10 : vector<2x128xf32>
    %cst_8 = arith.constant dense<0xFF800000> : vector<2xf32>
    %12 = vector.multi_reduction <maximumf>, %11, %cst_8 [1] : vector<2x128xf32> to vector<2xf32>
    %13 = vector.shape_cast %12 : vector<2xf32> to vector<2x1xf32>
    %14 = vector.broadcast %13 : vector<2x1xf32> to vector<2x128xf32>
    %15 = arith.subf %11, %14 : vector<2x128xf32>
    %16 = math.exp %15 : vector<2x128xf32>
    %cst_9 = arith.constant dense<0.000000e+00> : vector<2xf32>
    %17 = vector.multi_reduction <add>, %16, %cst_9 [1] : vector<2x128xf32> to vector<2xf32>
    %18 = vector.shape_cast %17 : vector<2xf32> to vector<2x1xf32>
    %19 = math.log %18 : vector<2x1xf32>
    %20 = vector.broadcast %19 : vector<2x1xf32> to vector<2x128xf32>
    %21 = arith.subf %15, %20 : vector<2x128xf32>
    %c0_10 = arith.constant 0 : index
    %c0_11 = arith.constant 0 : index
    %22 = vector.load %arg5[%c0_10, %c0_11] : memref<2x128xf32, #tpu.memory_space<vmem>>, vector<2x128xf32>
    tpu.vector_store %arg5[%c0_10, %c0_11], %21 {strides = array<i32>} : memref<2x128xf32, #tpu.memory_space<vmem>>, vector<2x128xf32>,
    return
  }
  func.func @transform_0(%arg0: i32) -> (i32, i32) {
    %c0_i32 = arith.constant 0 : i32
    %c0_i32_0 = arith.constant 0 : i32
    return %arg0, %c0_i32 : i32, i32
  }
  func.func @transform_1(%arg0: i32) -> (i32, i32) {
    %c0_i32 = arith.constant 0 : i32
    %c0_i32_0 = arith.constant 0 : i32
    %c0_i32_1 = arith.constant 0 : i32
    return %c0_i32, %c0_i32_0 : i32, i32
  }
  func.func @transform_2(%arg0: i32) -> (i32, i32) {
    %c0_i32 = arith.constant 0 : i32
    %c0_i32_0 = arith.constant 0 : i32
    %c0_i32_1 = arith.constant 0 : i32
    return %c0_i32, %c0_i32_0 : i32, i32
  }
  func.func @transform_3(%arg0: i32) -> (i32, i32) {
    %c0_i32 = arith.constant 0 : i32
    %c0_i32_0 = arith.constant 0 : i32
    %c0_i32_1 = arith.constant 0 : i32
    return %c0_i32, %c0_i32_0 : i32, i32
  }
  func.func @transform_4(%arg0: i32) -> (i32, i32) {
    %c0_i32 = arith.constant 0 : i32
    %c0_i32_0 = arith.constant 0 : i32
    return %arg0, %c0_i32 : i32, i32
  }
}

</mosaic_0001>

<bundles_post_ra>
// kernel: tpu_custom_call.1
= control target key start
LH: loop header
LB: loop body
LE: loop exit
PB: predicated region body
PF: predicated region fallthrough
CT: control target
= control target key end

     0   :  { %9 = vsyncpa [#allocation3], 0  ;;  %s1001_s0 = inlined_call_operand.hbm [shape: f32[2,784], index: 0, kind: input, shape index: {}]   ;;  %s1002_s1 = inlined_call_operand.hbm [shape: bf16[784,128], index: 1, kind: input, shape index: {}]   ;;  %s1003_s2 = inlined_call_operand.vmem [shape: f32[1,128], index: 2, kind: input, shape index: {}]   ;;  %s1004_s3 = inlined_call_operand.vmem [shape: f32[1,128], index: 3, kind: input, shape index: {}]   ;;  %s1005_s4 = inlined_call_operand.hbm [shape: f32[2,128], index: 4, kind: output, shape index: {}]  }
   0x1   :  { %10 = vsyncpa [#allocation6], 0 }
   0x2   :  { %11 = vsyncpa [#allocation4], 0  ;;  %s953_s15 = smov [#allocation2]   ;;  %s954_s17 = smov [#allocation5]  }
   0x3   :  { %s18_s16 = sshll.u32 %s953_s15, 4  ;;  %s27_s18 = sshll.u32 %s954_s17, 4  ;;  %s19_s16 = int_to_ptr.vmem [resolvable:$true] %s18_s16  ;;  %s28_s18 = int_to_ptr.vmem [resolvable:$true] %s27_s18 }
   0x4   :  { %s895_s19 = scalar_lea.vmem %s19_s16, 224  ;;  %p900_p1 = scmp.lt.s32.totalorder %s19_s16, %s19_s16 }
   0x5   :  { %p896_p0 = scmp.ne.s32.totalorder %s19_s16, %s895_s19  ;;  %p901_p2 = scmp.lt.s32.totalorder %s895_s19, %s895_s19 }
   0x7   :  { %p902_p3 = por %p901_p2, %p900_p1 }
   0x9   :  { %p903_p4 = pnand %p902_p3, %p896_p0 }
   0xb   :  { %906 = shalt.err (!%p903_p4)
}
   0xc   :  { %21 = dma.hbm_to_vmem [thread:$0]  %s1001_s0, 224, %s19_s16, [#allocation3]  }
   0xd   :  { %s915_s22 = scalar_lea.vmem %s28_s18, 6272  ;;  %p920_p6 = scmp.lt.s32.totalorder %s28_s18, %s28_s18 }
   0xe   :  { %p916_p5 = scmp.ne.s32.totalorder %s28_s18, %s915_s22  ;;  %p921_p7 = scmp.lt.s32.totalorder %s915_s22, %s915_s22 }
  0x10   :  { %p922_p8 = por %p921_p7, %p920_p6 }
  0x12   :  { %p923_p9 = pnand %p922_p8, %p916_p5 }
  0x14   :  { %926 = shalt.err (!%p923_p9)
}
  0x15   :  { %s955_s23 = smov 64   ;;  %s956_s24 = smov 4  }
  0x16   :  { %33 = dma.hbm_to_vmem [thread:$0]  %s1002_s1, 6272, %s28_s18, [#allocation6], %s955_s23, %s955_s23, %s956_s24  }
  0x17   :  { %947 = dma.done.wait [#allocation3], 224  }
  0x18   :  { %948 = vsyncadd [#allocation3], 4294967072 }
  0x19   :  { %949 = dma.done.wait [#allocation6], 6272  }
  0x1a   :  { %950 = vsyncadd [#allocation6], 4294961024  ;;  %v832_v0 = vld [vmem:[#allocation5 + $0x78] sm:$0xff]   ;;  %v836_v4 = vld [vmem:[#allocation5 + $0x70] sm:$0xff]   ;;  %v957_v21 = vmov 1983009808   ;;  %v53_v23 = vlaneseq }
  0x1b   :  { %v833_v1 = vld [vmem:[#allocation5 + $0x38] sm:$0xff]   ;;  %750 = vmatprep.subr.bf16.mxu0 %v832_v0  ;;  %v837_v5 = vld [vmem:[#allocation5 + $0x30] sm:$0xff]   ;;  %v840_v8 = vld [vmem:[#allocation5 + $0x68] sm:$0xff]   ;;  %v51_v22 = vunpack.c.l.s4 %v957_v21  ;;  %v958_v45 = vmov 0.0   ;;  %vm959_vm0 = vmmov 0   ;;  %vm495_vm1 = vcmask 130048  }
  0x1c   :  { %v834_v2 = vld [vmem:[#allocation5 + $0xf8] sm:$0xff]   ;;  %751 = vmatpush3.bf16.msra.mxu0 %v833_v1  ;;  %v838_v6 = vld [vmem:[#allocation5 + $0xf0] sm:$0xff]   ;;  %v841_v9 = vld [vmem:[#allocation5 + $0x28] sm:$0xff]   ;;  %v54_v29 = vshrl.u32 %v53_v23, 7  ;;  %vm668_vm2 = vcmask 1041408  }
  0x1d   :  { %v835_v3 = vld [vmem:[#allocation5 + $0xb8] sm:$0xff]   ;;  %772 = vmatprep.subr.bf16.mxu1 %v834_v2  ;;  %752 = vmatprep.subr.bf16.mxu0 %v836_v4  ;;  %v839_v7 = vld [vmem:[#allocation5 + $0xb0] sm:$0xff]   ;;  %v842_v10 = vld [vmem:[#allocation5 + $0xe8] sm:$0xff]   ;;  %v52_v28 = vunpack.c.0.s8 %v51_v22 }
  0x1e   :  { %773 = vmatpush3.bf16.msra.mxu1 %v835_v3  ;;  %v843_v11 = vld [vmem:[#allocation5 + $0xa8] sm:$0xff]   ;;  %v844_v12 = vld [vmem:[#allocation5 + $0x60] sm:$0xff]   ;;  %v848_v16 = vld [vmem:[#allocation5 + $0x58] sm:$0xff]  }
  0x1f   :  { %774 = vmatprep.subr.bf16.mxu1 %v838_v6  ;;  %v845_v13 = vld [vmem:[#allocation5 + $0x20] sm:$0xff]   ;;  %v849_v17 = vld [vmem:[#allocation5 + $0x18] sm:$0xff]   ;;  %v852_v20 = vld [vmem:[#allocation5 + $0x50] sm:$0xff]   ;;  %v55_v34 = vsub.s32 %v52_v28, %v54_v29 }
  0x20   :  { %753 = vmatpush3.bf16.msra.mxu0 %v837_v5  ;;  %v846_v14 = vld [vmem:[#allocation5 + $0xe0] sm:$0xff]   ;;  %v850_v18 = vld [vmem:[#allocation5 + $0xd8] sm:$0xff]   ;;  %v853_v24 = vld [vmem:[#allocation5 + $0x10] sm:$0xff]  }
  0x21   :  { %754 = vmatprep.subr.bf16.mxu0 %v840_v8  ;;  %v847_v15 = vld [vmem:[#allocation5 + $0xa0] sm:$0xff]   ;;  %v851_v19 = vld [vmem:[#allocation5 + $0x98] sm:$0xff]   ;;  %v854_v25 = vld [vmem:[#allocation5 + $0xd0] sm:$0xff]  }
  0x22   :  { %775 = vmatpush3.bf16.msra.mxu1 %v839_v7  ;;  %v855_v26 = vld [vmem:[#allocation5 + $0x90] sm:$0xff]   ;;  %v856_v27 = vld [vmem:[#allocation5 + $0x48] sm:$0xff]   ;;  %v860_v33 = vld [vmem:[#allocation5 + $0x40] sm:$0xff]  }
  0x23   :  { %776 = vmatprep.subr.bf16.mxu1 %v842_v10  ;;  %v857_v30 = vld [vmem:[#allocation5 + $0x8] sm:$0xff]   ;;  %v861_v35 = vld [vmem:[#allocation5] sm:$0xff]   ;;  %v45_v37 = vld [vmem:[#allocation2] sm:$0xff] }
  0x24   :  { %755 = vmatpush3.bf16.msra.mxu0 %v841_v9  ;;  %v858_v31 = vld [vmem:[#allocation5 + $0xc8] sm:$0xff]   ;;  %v862_v36 = vld [vmem:[#allocation5 + $0xc0] sm:$0xff]   ;;  %v56_v38 = vrot.slane %v45_v37, %v55_v34  ;;  %v49_v40 = vcombine.high %v45_v37, %v45_v37  ;;  %v864_v41 = vld [vmem:[#allocation5 + $0x178] sm:$0xff]  }
  0x25   :  { %756 = vmatprep.subr.bf16.mxu0 %v844_v12  ;;  %v859_v32 = vld [vmem:[#allocation5 + $0x88] sm:$0xff]   ;;  %v863_v39 = vld [vmem:[#allocation5 + $0x80] sm:$0xff]   ;;  %v866_v48 = vld [vmem:[#allocation5 + $0x138] sm:$0xff]  }
  0x26   :  { %777 = vmatpush3.bf16.msra.mxu1 %v843_v11  ;;  %v64_v42 = vcombine.high %v56_v38, %v56_v38  ;;  %v63_v43 = vrot.slane %v49_v40, %v55_v34  ;;  %v89_v44 = vpack.c.bf16 %v56_v38, %v56_v38  ;;  %v867_v50 = vld [vmem:[#allocation5 + $0x170] sm:$0xff]   ;;  %v869_v53 = vld [vmem:[#allocation5 + $0x168] sm:$0xff]   ;;  %v871_v55 = vld [vmem:[#allocation5 + $0x160] sm:$0xff]  }
  0x27   :  { %778 = vmatprep.subr.bf16.mxu1 %v846_v14  ;;  %v868_v52 = vld [vmem:[#allocation5 + $0x130] sm:$0xff]   ;;  %v870_v54 = vld [vmem:[#allocation5 + $0x128] sm:$0xff]   ;;  %v872_v56 = vld [vmem:[#allocation5 + $0x120] sm:$0xff]  }
  0x28   :  { %757 = vmatpush3.bf16.msra.mxu0 %v845_v13  ;;  %v90_v46 = vpack.c.bf16 %v64_v42, %v64_v42  ;;  %v65_v47 = vcombine.high %v63_v43, %v63_v43  ;;  %v91_v49 = vpack.c.bf16 %v63_v43, %v63_v43  ;;  %v873_v57 = vld [vmem:[#allocation5 + $0x158] sm:$0xff]   ;;  %v881_v58 = vld [vmem:[#allocation5 + $0x180] sm:$0xff]   ;;  %v875_v1 = vld [vmem:[#allocation5 + $0x150] sm:$0xff]  }
  0x29   :  { %758 = vmatprep.subr.bf16.mxu0 %v848_v16  ;;  %v46_v59 = vld [vmem:[#allocation2 + $0x8] sm:$0x3f]  ;;  %v876_v4 = vld [vmem:[#allocation5 + $0x110] sm:$0xff]   ;;  %v877_v5 = vld [vmem:[#allocation5 + $0x148] sm:$0xff]  }
  0x2a   :  { %779 = vmatpush3.bf16.msra.mxu1 %v847_v15  ;;  %531 = vmatprep.mubr.bf16.mxu0 %v90_v46  ;;  %v92_v51 = vpack.c.bf16 %v65_v47, %v65_v47  ;;  %v66_v60 = vcombine.high %v46_v59, %v46_v59  ;;  %v73_v61 = vrot.slane %v46_v59, %v55_v34  ;;  %v874_v62 = vld [vmem:[#allocation5 + $0x118] sm:$0xff]   ;;  %v878_v6 = vld [vmem:[#allocation5 + $0x108] sm:$0xff]   ;;  %v879_v7 = vld [vmem:[#allocation5 + $0x140] sm:$0xff]  }
  0x2b   :  { %780 = vmatprep.subr.bf16.mxu1 %v850_v18  ;;  %v880_v8 = vld [vmem:[#allocation5 + $0x100] sm:$0xff]   ;;  %v698_v23 = vld [vmem:[%s1003_s2] ss:$0 sm:$0xff]  ;;  %s960_s2 = smov [#allocation7]  }
  0x2c   :  { %759 = vmatpush3.bf16.msra.mxu0 %v849_v17  ;;  %571 = vmatprep.mubr.bf16.mxu1 %v92_v51  ;;  %v80_v63 = vrot.slane %v66_v60, %v55_v34  ;;  %v81_v0 = vcombine.high %v73_v61, %v73_v61  ;;  %v93_v9 = vpack.c.bf16 %v73_v61, %v73_v61  ;;  %v749_v34 = vld [vmem:[%s1004_s3] ss:$0 sm:$0xff]  ;;  %s688_s29 = sshll.u32 %s960_s2, 4  ;;  %s689_s29 = int_to_ptr.vmem [resolvable:$true] %s688_s29 }
  0x2d   :  { %760 = vmatprep.subr.bf16.mxu0 %v852_v20  ;;  %s927_s3 = scalar_lea.vmem %s689_s29, 32  ;;  %p932_p11 = scmp.lt.s32.totalorder %s689_s29, %s689_s29 }
  0x2e   :  { %781 = vmatpush3.bf16.msra.mxu1 %v851_v19  ;;  %v94_v2 = vpack.c.bf16 %v81_v0, %v81_v0  ;;  %v95_v3 = vpack.c.bf16 %v80_v63, %v80_v63  ;;  %p928_p10 = scmp.ne.s32.totalorder %s689_s29, %s927_s3  ;;  %p933_p12 = scmp.lt.s32.totalorder %s927_s3, %s927_s3 }
  0x2f   :  { %782 = vmatprep.subr.bf16.mxu1 %v854_v25 }
  0x30   :  { %761 = vmatpush3.bf16.msra.mxu0 %v853_v24  ;;  %p934_p13 = por %p933_p12, %p932_p11 }
  0x31   :  { %762 = vmatprep.subr.bf16.mxu0 %v856_v27 }
  0x32   :  { %783 = vmatpush3.bf16.msra.mxu1 %v855_v26  ;;  %p935_p0 = pnand %p934_p13, %p928_p10 }
  0x33   :  { %784 = vmatprep.subr.bf16.mxu1 %v858_v31 }
  0x34   :  { %763 = vmatpush3.bf16.msra.mxu0 %v857_v30 }
  0x35   :  { %764 = vmatprep.subr.bf16.mxu0 %v860_v33 }
  0x36   :  { %785 = vmatpush3.bf16.msra.mxu1 %v859_v32 }
  0x37   :  { %786 = vmatprep.subr.bf16.mxu1 %v862_v36 }
  0x38   :  { %765 = vmatpush3.bf16.msra.mxu0 %v861_v35 }
  0x39   :  { %794 = vmatprep.subr.bf16.mxu0 %v864_v41 }
  0x3a   :  { %787 = vmatpush3.bf16.msra.mxu1 %v863_v39 }
  0x3b   :  { %818 = vmatprep.subr.bf16.mxu1 %v958_v45  ;;  %532 = vmatmul.mubr.bf16.vlgmr.msra.gmra.mxu0 %v89_v44 }
  0x3c   :  { %795 = vmatpush3.bf16.msra.mxu0 %v866_v48  ;;  %611 = vmatprep.mubr.bf16.mxu0 %v94_v2 }
  0x3d   :  { %572 = vmatmul.mubr.bf16.vlgmr.msra.gmra.mxu1 %v91_v49  ;;  %796 = vmatprep.subr.bf16.mxu0 %v867_v50 }
  0x3e   :  { %820 = vmatprep.mubr.msk.bf16.mxu1 %vm959_vm0, %v958_v45  ;;  %819 = vmatpush3.bf16.msra.mxu1 %v881_v58 }
  0x40   :  { %797 = vmatpush3.bf16.msra.mxu0 %v868_v52 }
  0x41   :  { %798 = vmatprep.subr.bf16.mxu0 %v869_v53 }
  0x44   :  { %799 = vmatpush3.bf16.msra.mxu0 %v870_v54 }
  0x45   :  { %800 = vmatprep.subr.bf16.mxu0 %v871_v55  ;;  %821 = vmatmul.mubr.msk.bf16.vlgmr.msra.gmra.mxu1 %vm495_vm1, %v95_v3 }
  0x48   :  { %801 = vmatpush3.bf16.msra.mxu0 %v872_v56 }
  0x49   :  { %802 = vmatprep.subr.bf16.mxu0 %v873_v57 }
  0x4c   :  { %803 = vmatpush3.bf16.msra.mxu0 %v874_v62 }
  0x4d   :  { %804 = vmatprep.subr.bf16.mxu0 %v875_v1 }
  0x50   :  { %805 = vmatpush3.bf16.msra.mxu0 %v876_v4 }
  0x51   :  { %806 = vmatprep.subr.bf16.mxu0 %v877_v5 }
  0x54   :  { %807 = vmatpush3.bf16.msra.mxu0 %v878_v6 }
  0x55   :  { %808 = vmatprep.subr.bf16.mxu0 %v879_v7 }
  0x58   :  { %809 = vmatpush3.bf16.msra.mxu0 %v880_v8 }
  0x5b   :  { %612 = vmatmul.mubr.bf16.vlgmr.msra.gmra.mxu0 %v93_v9 }
  0xfb   :  { %v766_v10 = vpop.f32.mrf.mxu0 }
  0xfd   :  { %v767_v11 = vpop.f32.mrf.mxu0  ;;  %v788_v12 = vpop.f32.mrf.mxu1 }
  0xfe   :  { %v768_v22 = vadd.f32 %v767_v11, %v766_v10 }
  0xff   :  { %v769_v13 = vpop.f32.mrf.mxu0  ;;  %v789_v14 = vpop.f32.mrf.mxu1 }
 0x100   :  { %v534_v24 = vadd.f32 %v768_v22, %v698_v23  ;;  %v790_v25 = vadd.f32 %v789_v14, %v788_v12 }
 0x101   :  { %v770_v15 = vpop.f32.mrf.mxu0  ;;  %v791_v16 = vpop.f32.mrf.mxu1 }
 0x102   :  { %v574_v28 = vadd.f32 %v790_v25, %v534_v24 }
 0x103   :  { %v792_v17 = vpop.f32.mrf.mxu1 }
 0x105   :  { %v653_v18 = vpop.f32.mrf.mxu1 }
 0x107   :  { %v822_v19 = vpop.f32.mrf.mxu1 }
 0x109   :  { %v656_v20 = vpop.f32.mrf.mxu1 }
 0x10b   :  { %v823_v21 = vpop.f32.mrf.mxu1 }
 0x11b   :  { %v810_v26 = vpop.f32.mrf.mxu0 }
 0x11d   :  { %v811_v27 = vpop.f32.mrf.mxu0 }
 0x11e   :  { %v812_v29 = vadd.f32 %v811_v27, %v810_v26 }
 0x11f   :  { %v813_v30 = vpop.f32.mrf.mxu0 }
 0x120   :  { %v614_v31 = vadd.f32 %v812_v29, %v574_v28 }
 0x121   :  { %v814_v32 = vpop.f32.mrf.mxu0 }
 0x122   :  { %v654_v33 = vadd.f32 %v653_v18, %v614_v31 }
 0x124   :  { %v659_v35 = vmax.f32 %v654_v33, 0.0 }
 0x126   :  { %v667_v36 = vadd.f32 %v749_v34, %v659_v35 }
 0x128   :  { %v669_v37 = vsel %vm668_vm2, %v667_v36, -inf }
 0x129   :  { %670 = vmax.xlane.f32.xlu0 %v669_v37 }
 0x1b2   :  { %v671_v38 = vpop.xlane.xlu0 %670 }
 0x1b3   :  { %v672_v39 = vsub.f32 %v667_v36, %v671_v38 }
 0x1b5   :  { %v673_v40 = vmul.f32 1.442695, %v672_v39 }
 0x1b7   :  { %883 = vpow2.f32 %v673_v40 }
 0x1c4   :  { %v884_v41 = vpop.eup %883 }
 0x1c5   :  { %v675_v42 = vsel %vm668_vm2, %v884_v41, 0.0 }
 0x1c6   :  { %676 = vadd.xlane.f32.xlu0 %v675_v42 }
 0x24f   :  { %v677_v43 = vpop.xlane.xlu0 %676 }
 0x250   :  { %885 = vlog2.f32 %v677_v43 }
 0x25d   :  { %v886_v44 = vpop.eup %885 }
 0x25e   :  { %v679_v45 = vmul.f32 0.6931472, %v886_v44 }
 0x260   :  { %v680_v46 = vsub.f32 %v672_v39, %v679_v45 }
 0x262   :  { %681 = vst [vmem:[#allocation7] sm:$0x3] %v680_v46 }
 0x263   :  { %938 = shalt.err (!%p935_p0)
}
 0x264   :  { %691 = dma.vmem_to_hbm [thread:$0]  %s689_s29, 32, %s1005_s4, [#allocation4]  }
 0x265   :  { %951 = dma.done.wait [#allocation4], 32  }
 0x266   :  { %952 = vsyncadd [#allocation4], 4294967264 }
 0x267   :  { %695 = vsyncpa [#allocation3], 1 }
 0x268   :  { %696 = vsyncpa [#allocation6], 1 }
 0x269   :  { %697 = vsyncpa [#allocation4], 1 }

</bundles_post_ra>
